<compile_context>
chip_gen: v7x
topology: tpu7x:2x2x1
jax: 0.10.0
libtpu: 0.0.40
codegen_flags: <defaults>
</compile_context>

<pallas_src>
import math
from functools import partial

import jax
import jax.numpy as jnp
from jax import lax
from jax.experimental import pallas as pl
from jax.experimental.pallas import tpu as pltpu


_MASK_VALUE = -1e30      # finite stand-in for -inf (keeps the online softmax NaN-free)
_DEF_BLOCK_Q = 256       # query-row tile for attention
_DEF_BLOCK_KV = 512      # key/value tile for attention
_DEF_BLOCK_ROWS = 256    # row tile for the projection kernels


def _row_tile(size, block):
    """Full extent when it fits in one block, else the (8-aligned) block size."""
    return size if size <= block else block


def _compiler_params(dim_sem, resident_bytes=0):
    kwargs = dict(dimension_semantics=dim_sem)
    if resident_bytes > (8 << 20):
        # Large resident weights: raise the scoped-VMEM limit (v5e default is
        # only 16 MiB).  TODO(synk): for very large d_model on v7x (64 MiB
        # physical VMEM) the d_out axis of the weights should be tiled instead.
        kwargs["vmem_limit_bytes"] = int(min(2 * resident_bytes + (16 << 20), 100 << 20))
    return pltpu.CompilerParams(**kwargs)


# ---------------------------------------------------------------------------
# Q/K/V projection kernels: write outputs directly in [B, h, S, d_k] layout.
# ---------------------------------------------------------------------------
def _qkv_proj_kernel(x_ref, wq_ref, wk_ref, wv_ref, bq_ref, bk_ref, bv_ref,
                     q_ref, k_ref, v_ref):
    # x: (tm, d_model) f32; w*: (h, d_model, d_k) bf16 resident; b*: (h, 1, d_k) f32.
    hd = pl.program_id(2)
    x = x_ref[...].astype(jnp.bfloat16)

    def one(w_ref, b_ref, o_ref):
        acc = jnp.dot(x, w_ref[hd], preferred_element_type=jnp.float32)
        o_ref[...] = (acc + b_ref[hd]).astype(o_ref.dtype)

    one(wq_ref, bq_ref, q_ref)
    one(wk_ref, bk_ref, k_ref)
    one(wv_ref, bv_ref, v_ref)


def _single_proj_kernel(x_ref, w_ref, b_ref, o_ref):
    hd = pl.program_id(2)
    x = x_ref[...].astype(jnp.bfloat16)
    acc = jnp.dot(x, w_ref[hd], preferred_element_type=jnp.float32)
    o_ref[...] = (acc + b_ref[hd]).astype(o_ref.dtype)


def _project_heads_fused(x, w_heads, b_heads, *, block_rows=_DEF_BLOCK_ROWS):
    """Fused Q/K/V projection: x is read from HBM exactly once.

    x: [B, S, d_model] f32; w_heads: 3 x [h, d_model, d_k] bf16;
    b_heads: 3 x [h, 1, d_k] f32.  Returns (q, k, v) each [B, h, S, d_k] bf16.
    """
    B, S, d_model = x.shape
    h, _, d_k = w_heads[0].shape
    tm = _row_tile(S, block_rows)
    grid = (B, pl.cdiv(S, tm), h)           # h innermost: x block fetched once per row tile

    x_spec = pl.BlockSpec((None, tm, d_model), lambda b, si, hd: (b, si, 0))
    w_spec = pl.BlockSpec((h, d_model, d_k), lambda b, si, hd: (0, 0, 0))   # resident
    b_spec = pl.BlockSpec((h, 1, d_k), lambda b, si, hd: (0, 0, 0))         # resident
    o_spec = pl.BlockSpec((None, None, tm, d_k), lambda b, si, hd: (b, hd, si, 0))

    out_sds = jax.ShapeDtypeStruct((B, h, S, d_k), jnp.bfloat16)
    resident = sum(int(w.size) for w in w_heads) * 2

    return pl.pallas_call(
        _qkv_proj_kernel,
        out_shape=(out_sds, out_sds, out_sds),
        grid_spec=pltpu.PrefetchScalarGridSpec(
            num_scalar_prefetch=0,
            grid=grid,
            in_specs=[x_spec, w_spec, w_spec, w_spec, b_spec, b_spec, b_spec],
            out_specs=(o_spec, o_spec, o_spec),
        ),
        compiler_params=_compiler_params(("parallel", "parallel", "parallel"),
                                         resident),
    )(x, *w_heads, *b_heads)


def _project_heads(x, w_head, b_head, *, block_rows=_DEF_BLOCK_ROWS):
    """Single projection to per-head layout: returns [B, h, S, d_k] bf16."""
    B, S, d_model = x.shape
    h, _, d_k = w_head.shape
    tm = _row_tile(S, block_rows)
    grid = (B, pl.cdiv(S, tm), h)

    return pl.pallas_call(
        _single_proj_kernel,
        out_shape=jax.ShapeDtypeStruct((B, h, S, d_k), jnp.bfloat16),
        grid_spec=pltpu.PrefetchScalarGridSpec(
            num_scalar_prefetch=0,
            grid=grid,
            in_specs=[
                pl.BlockSpec((None, tm, d_model), lambda b, si, hd: (b, si, 0)),
                pl.BlockSpec((h, d_model, d_k), lambda b, si, hd: (0, 0, 0)),
                pl.BlockSpec((h, 1, d_k), lambda b, si, hd: (0, 0, 0)),
            ],
            out_specs=pl.BlockSpec((None, None, tm, d_k),
                                   lambda b, si, hd: (b, hd, si, 0)),
        ),
        compiler_params=_compiler_params(("parallel", "parallel", "parallel"),
                                         int(w_head.size) * 2),
    )(x, w_head, b_head)


# ---------------------------------------------------------------------------
# Flash-style scaled-dot-product attention (online softmax over kv tiles).
# ---------------------------------------------------------------------------
def _flash_attn_kernel(lens_ref, q_ref, k_ref, v_ref, o_ref,
                       m_sc, l_sc, acc_sc, *, scale, block_k):
    b = pl.program_id(0)
    ki = pl.program_id(3)
    kv_len = lens_ref[b]

    @pl.when(ki == 0)
    def _init():
        m_sc[...] = jnp.full_like(m_sc, -jnp.inf)
        l_sc[...] = jnp.zeros_like(l_sc)
        acc_sc[...] = jnp.zeros_like(acc_sc)

    @pl.when(ki * block_k < kv_len)          # skip fully-masked / padded kv tiles
    def _compute():
        q = q_ref[...] * scale               # fold 1/sqrt(d_k) into the small q tile
        k = k_ref[...]
        # scores = q @ k^T (contract d_k; bf16 inputs, f32 accumulation on MXU)
        s = lax.dot_general(q, k, (((1,), (1,)), ((), ())),
                            preferred_element_type=jnp.float32)       # (tq, tk)

        # in-kernel key-padding mask from the scalar-prefetched length
        col = ki * block_k + lax.broadcasted_iota(jnp.int32, (1, block_k), 1)
        s = jnp.where(col < kv_len, s, _MASK_VALUE)

        m_prev = m_sc[...]
        m_new = jnp.maximum(m_prev, jnp.max(s, axis=-1, keepdims=True))
        alpha = jnp.exp(m_prev - m_new)
        p = jnp.exp(s - m_new)               # exactly 0 at masked columns

        # zero invalid value rows so 0 * garbage can never poison the accumulator
        row = ki * block_k + lax.broadcasted_iota(jnp.int32, (block_k, 1), 0)
        v = v_ref[...]
        v = jnp.where(row < kv_len, v, jnp.zeros_like(v))

        l_sc[...] = alpha * l_sc[...] + jnp.sum(p, axis=-1, keepdims=True)
        acc_sc[...] = alpha * acc_sc[...] + jnp.dot(
            p.astype(v.dtype), v, preferred_element_type=jnp.float32)
        m_sc[...] = m_new

    @pl.when(ki == pl.num_programs(3) - 1)
    def _epilogue():
        o_ref[...] = (acc_sc[...] *
                      pl.reciprocal(l_sc[...], approx=True)).astype(o_ref.dtype)


def _flash_attention(q, k, v, kv_lens, *, block_q=_DEF_BLOCK_Q,
                     block_kv=_DEF_BLOCK_KV):
    """q: [B, h, Sq, d_k]; k, v: [B, h, Sk, d_k] (bf16); kv_lens: [B] int32."""
    B, h, Sq, d_k = q.shape
    Sk = k.shape[2]
    tq = _row_tile(Sq, block_q)
    tk = _row_tile(Sk, block_kv)
    grid = (B, h, pl.cdiv(Sq, tq), pl.cdiv(Sk, tk))
    scale = 1.0 / math.sqrt(d_k)

    q_spec = pl.BlockSpec((None, None, tq, d_k),
                          lambda b, hd, qi, ki, lens: (b, hd, qi, 0))
    kv_spec = pl.BlockSpec((None, None, tk, d_k),
                           lambda b, hd, qi, ki, lens: (b, hd, ki, 0))
    o_spec = pl.BlockSpec((None, None, tq, d_k),
                          lambda b, hd, qi, ki, lens: (b, hd, qi, 0))

    return pl.pallas_call(
        partial(_flash_attn_kernel, scale=scale, block_k=tk),
        out_shape=jax.ShapeDtypeStruct((B, h, Sq, d_k), q.dtype),
        grid_spec=pltpu.PrefetchScalarGridSpec(
            num_scalar_prefetch=1,
            grid=grid,
            in_specs=[q_spec, kv_spec, kv_spec],
            out_specs=o_spec,
            scratch_shapes=[
                pltpu.VMEM((tq, 1), jnp.float32),      # running max
                pltpu.VMEM((tq, 1), jnp.float32),      # running sum
                pltpu.VMEM((tq, d_k), jnp.float32),    # accumulator
            ],
        ),
        compiler_params=_compiler_params(
            ("parallel", "parallel", "parallel", "arbitrary")),
    )(kv_lens, q, k, v)


# ---------------------------------------------------------------------------
# Output projection: merge-heads + Wo fused as a reduction over the head axis.
# ---------------------------------------------------------------------------
def _out_proj_kernel(x_ref, w_ref, b_ref, o_ref, acc_sc):
    hd = pl.program_id(2)

    @pl.when(hd == 0)
    def _init():
        acc_sc[...] = jnp.zeros_like(acc_sc) + b_ref[...]

    acc_sc[...] += jnp.dot(x_ref[...], w_ref[hd],
                           preferred_element_type=jnp.float32)

    @pl.when(hd == pl.num_programs(2) - 1)
    def _fin():
        o_ref[...] = acc_sc[...].astype(o_ref.dtype)


def _output_projection(attn, w_o, b_o, out_dtype, *, block_rows=_DEF_BLOCK_ROWS):
    """attn: [B, h, Sq, d_k] bf16; w_o: [h, d_k, d_model] bf16; b_o: [1, d_model]."""
    B, h, Sq, d_k = attn.shape
    d_model = w_o.shape[-1]
    tm = _row_tile(Sq, block_rows)
    grid = (B, pl.cdiv(Sq, tm), h)

    return pl.pallas_call(
        _out_proj_kernel,
        out_shape=jax.ShapeDtypeStruct((B, Sq, d_model), out_dtype),
        grid_spec=pltpu.PrefetchScalarGridSpec(
            num_scalar_prefetch=0,
            grid=grid,
            in_specs=[
                pl.BlockSpec((None, None, tm, d_k), lambda b, si, hd: (b, hd, si, 0)),
                pl.BlockSpec((h, d_k, d_model), lambda b, si, hd: (0, 0, 0)),  # resident
                pl.BlockSpec((1, d_model), lambda b, si, hd: (0, 0)),          # resident
            ],
            out_specs=pl.BlockSpec((None, tm, d_model), lambda b, si, hd: (b, si, 0)),
            scratch_shapes=[pltpu.VMEM((tm, d_model), jnp.float32)],
        ),
        compiler_params=_compiler_params(("parallel", "parallel", "arbitrary"),
                                         int(w_o.size) * 2),
    )(attn, w_o, b_o)


# ---------------------------------------------------------------------------
# Full MultiHeadedAttention forward.
# ---------------------------------------------------------------------------
def multi_headed_attention(query, key, value, params, h, mask=None,
                           *, block_q=_DEF_BLOCK_Q, block_kv=_DEF_BLOCK_KV,
                           block_rows=_DEF_BLOCK_ROWS):
    """query/key/value: [B, S, d_model] f32.  params: wq/wk/wv/wo stored
    [d_in, d_out], bq/bk/bv/bo [d_out].  mask: key-padding mask ([B, Sk],
    [B, 1, Sk] or [B, Sq, Sk] with identical rows); 1 = attend, 0 = masked."""
    B, Sq, d_model = query.shape
    Sk = key.shape[1]
    assert d_model % h == 0
    d_k = d_model // h

    # Weights in per-head layout + bf16 (tiny one-off d_model^2 reshuffle; in a
    # real model this would be done once at parameter-load time).
    def _to_head_weight(w):      # [d_model, h*d_k] -> [h, d_model, d_k]
        return jnp.transpose(w.reshape(d_model, h, d_k), (1, 0, 2)).astype(jnp.bfloat16)

    def _to_head_bias(b):        # [h*d_k] -> [h, 1, d_k]
        return b.reshape(h, 1, d_k).astype(jnp.float32)

    wq_h, wk_h, wv_h = (_to_head_weight(params["wq"]),
                        _to_head_weight(params["wk"]),
                        _to_head_weight(params["wv"]))
    bq_h, bk_h, bv_h = (_to_head_bias(params["bq"]),
                        _to_head_bias(params["bk"]),
                        _to_head_bias(params["bv"]))
    wo_h = params["wo"].reshape(h, d_k, d_model).astype(jnp.bfloat16)
    bo_h = params["bo"].reshape(1, d_model).astype(jnp.float32)

    # Mask -> per-batch valid-key length (scalar-prefetched into SMEM).
    # TODO(synk): only key-padding (valid-prefix) masks are supported by this
    # fast path; arbitrary per-query dense masks of the original module are not.
    if mask is None:
        kv_lens = jnp.full((B,), Sk, dtype=jnp.int32)
    else:
        m = jnp.asarray(mask)
        if m.ndim == 3:
            m = m[:, 0, :]                      # key-padding: all query rows identical
        m = jnp.broadcast_to(m, (B, Sk))
        kv_lens = jnp.minimum((m != 0).sum(axis=-1), Sk).astype(jnp.int32)

    # Q/K/V projections written directly in [B, h, S, d_k] layout (no XLA transposes).
    if (query is key) and (key is value):
        q_h, k_h, v_h = _project_heads_fused(query, (wq_h, wk_h, wv_h),
                                             (bq_h, bk_h, bv_h),
                                             block_rows=block_rows)
    else:
        q_h = _project_heads(query, wq_h, bq_h, block_rows=block_rows)
        k_h = _project_heads(key, wk_h, bk_h, block_rows=block_rows)
        v_h = _project_heads(value, wv_h, bv_h, block_rows=block_rows)

    # Flash attention with the online softmax over kv tiles.
    attn = _flash_attention(q_h, k_h, v_h, kv_lens,
                            block_q=block_q, block_kv=block_kv)

    # Merge-heads + output projection fused as a reduction over the head axis.
    out = _output_projection(attn, wo_h, bo_h, query.dtype, block_rows=block_rows)
    # TODO(synk): dropout(p=0.1) on the attention probabilities is omitted
    # (eval-mode forward) and p_attn is not returned.
    return out


# ---------------------------------------------------------------------------
if __name__ == "__main__":
    B, S, d_model, h = 2, 8, 32, 4
    d_k = d_model // h

    root = jax.random.PRNGKey(0)
    ks = jax.random.split(root, 12)

    def mk_lin(kw, kb):
        w = jax.random.normal(kw, (d_model, d_model), jnp.float32) * 0.05
        b = jax.random.normal(kb, (d_model,), jnp.float32) * 0.05
        return w, b

    wq, bq = mk_lin(ks[0], ks[1])
    wk, bk = mk_lin(ks[2], ks[3])
    wv, bv = mk_lin(ks[4], ks[5])
    wo, bo = mk_lin(ks[6], ks[7])
    params = dict(wq=wq, bq=bq, wk=wk, bk=bk, wv=wv, bv=bv, wo=wo, bo=bo)

    # ---- pure f32 JAX reference (same math as the PyTorch module) -----------
    def reference(query, key, value, mask):
        def lin(x, w, b):
            return x @ w + b

        def heads(x):
            Bx, Sx, _ = x.shape
            return x.reshape(Bx, Sx, h, d_k).transpose(0, 2, 1, 3)

        q = heads(lin(query, wq, bq))
        k = heads(lin(key, wk, bk))
        v = heads(lin(value, wv, bv))
        scores = jnp.einsum("bhqd,bhkd->bhqk", q, k) / math.sqrt(d_k)
        if mask is not None:
            m = jnp.broadcast_to(mask, (query.shape[0], query.shape[1], key.shape[1]))
            scores = jnp.where(m[:, None, :, :] == 0, _MASK_VALUE, scores)
        p = jax.nn.softmax(scores, axis=-1)
        o = jnp.einsum("bhqk,bhkd->bhqd", p, v)
        o = o.transpose(0, 2, 1, 3).reshape(query.shape[0], query.shape[1], d_model)
        return lin(o, wo, bo)

    # ---- test 1: self-attention (fused QKV path) with a key-padding mask ----
    x = jax.random.normal(ks[8], (B, S, d_model), jnp.float32)
    lens1 = jnp.array([8, 5])
    mask1 = (jnp.arange(S)[None, None, :] < lens1[:, None, None]).astype(jnp.int32)

    out1 = jax.block_until_ready(
        multi_headed_attention(x, x, x, params, h, mask=mask1))
    ref1 = reference(x, x, x, mask1)
    err1 = float(jnp.max(jnp.abs(out1 - ref1)))
    assert out1.shape == (B, S, d_model)
    assert jnp.allclose(out1, ref1, atol=2e-2, rtol=2e-2), f"self-attn err={err1}"

    # ---- test 2: cross attention, multiple kv tiles, fully-masked tail tiles -
    Sk2 = 32
    q2 = jax.random.normal(ks[9], (B, S, d_model), jnp.float32)
    kv2 = jax.random.normal(ks[10], (B, Sk2, d_model), jnp.float32)
    lens2 = jnp.array([32, 11])
    mask2 = (jnp.arange(Sk2)[None, None, :] < lens2[:, None, None]).astype(jnp.int32)

    out2 = jax.block_until_ready(
        multi_headed_attention(q2, kv2, kv2, params, h, mask=mask2, block_kv=8))
    ref2 = reference(q2, kv2, kv2, mask2)
    err2 = float(jnp.max(jnp.abs(out2 - ref2)))
    assert out2.shape == (B, S, d_model)
    assert jnp.allclose(out2, ref2, atol=2e-2, rtol=2e-2), f"cross-attn err={err2}"

    print("KERNEL_OK")
</pallas_src>

<mosaic_0001>
module attributes {stable_mosaic.version = 11 : i64} {
  func.func @_qkv_proj_kernel(%arg0: i32, %arg1: i32, %arg2: i32, %arg3: memref<1x8x32xf32, #tpu.memory_space<vmem>>, %arg4: memref<4x32x8xbf16, #tpu.memory_space<vmem>>, %arg5: memref<4x32x8xbf16, #tpu.memory_space<vmem>>, %arg6: memref<4x32x8xbf16, #tpu.memory_space<vmem>>, %arg7: memref<4x1x8xf32, #tpu.memory_space<vmem>>, %arg8: memref<4x1x8xf32, #tpu.memory_space<vmem>>, %arg9: memref<4x1x8xf32, #tpu.memory_space<vmem>>, %arg10: memref<1x1x8x8xbf16, #tpu.memory_space<vmem>>, %arg11: memref<1x1x8x8xbf16, #tpu.memory_space<vmem>>, %arg12: memref<1x1x8x8xbf16, #tpu.memory_space<vmem>>) attributes {dimension_semantics = [#tpu.dimension_semantics<parallel>, #tpu.dimension_semantics<parallel>, #tpu.dimension_semantics<parallel>], iteration_bounds = array<i64: 2, 1, 4>, scalar_prefetch = 0 : i64, scratch_operands = 0 : i64, tpu.core_type = #tpu.core_type<tc>, window_params = [{transform_indices = @transform_0, window_bounds = array<i64: 1, 8, 32>}, {pipeline_mode = #tpu.pipeline_mode<synchronous>, transform_indices = @transform_1, window_bounds = array<i64: 4, 32, 8>}, {pipeline_mode = #tpu.pipeline_mode<synchronous>, transform_indices = @transform_2, window_bounds = array<i64: 4, 32, 8>}, {pipeline_mode = #tpu.pipeline_mode<synchronous>, transform_indices = @transform_3, window_bounds = array<i64: 4, 32, 8>}, {pipeline_mode = #tpu.pipeline_mode<synchronous>, transform_indices = @transform_4, window_bounds = array<i64: 4, 1, 8>}, {pipeline_mode = #tpu.pipeline_mode<synchronous>, transform_indices = @transform_5, window_bounds = array<i64: 4, 1, 8>}, {pipeline_mode = #tpu.pipeline_mode<synchronous>, transform_indices = @transform_6, window_bounds = array<i64: 4, 1, 8>}, {transform_indices = @transform_7, window_bounds = array<i64: 1, 1, 8, 8>}, {transform_indices = @transform_8, window_bounds = array<i64: 1, 1, 8, 8>}, {transform_indices = @transform_9, window_bounds = array<i64: 1, 1, 8, 8>}]} {
    %c0 = arith.constant 0 : index
    %c0_0 = arith.constant 0 : index
    %c0_1 = arith.constant 0 : index
    %0 = vector.load %arg3[%c0, %c0_0, %c0_1] : memref<1x8x32xf32, #tpu.memory_space<vmem>>, vector<1x8x32xf32>
    %1 = vector.shape_cast %0 : vector<1x8x32xf32> to vector<8x32xf32>
    %2 = arith.truncf %1 : vector<8x32xf32> to vector<8x32xbf16>
    %3 = arith.index_cast %arg2 : i32 to index
    %c0_2 = arith.constant 0 : index
    %c0_3 = arith.constant 0 : index
    %4 = vector.load %arg4[%3, %c0_2, %c0_3] : memref<4x32x8xbf16, #tpu.memory_space<vmem>>, vector<1x32x8xbf16>
    %5 = vector.shape_cast %4 : vector<1x32x8xbf16> to vector<32x8xbf16>
    %cst = arith.constant dense<0.000000e+00> : vector<8x8xf32>
    %6 = tpu.matmul %2, %5, %cst {dimension_numbers = #tpu.dot_dimension_numbers<[1], [0], [0], [1], [0, 0, 1, 1], [], []>} : vector<8x32xbf16>, vector<32x8xbf16>, vector<8x8xf32> -> vector<8x8xf32>
    %7 = arith.index_cast %arg2 : i32 to index
    %c0_4 = arith.constant 0 : index
    %c0_5 = arith.constant 0 : index
    %8 = vector.load %arg7[%7, %c0_4, %c0_5] : memref<4x1x8xf32, #tpu.memory_space<vmem>>, vector<1x1x8xf32>
    %9 = vector.shape_cast %8 : vector<1x1x8xf32> to vector<1x8xf32>
    %10 = vector.broadcast %9 : vector<1x8xf32> to vector<8x8xf32>
    %11 = arith.addf %6, %10 : vector<8x8xf32>
    %12 = arith.truncf %11 : vector<8x8xf32> to vector<8x8xbf16>
    %c0_6 = arith.constant 0 : index
    %c0_7 = arith.constant 0 : index
    %c0_8 = arith.constant 0 : index
    %c0_9 = arith.constant 0 : index
    %13 = vector.load %arg10[%c0_6, %c0_7, %c0_8, %c0_9] : memref<1x1x8x8xbf16, #tpu.memory_space<vmem>>, vector<1x1x8x8xbf16>
    %14 = vector.shape_cast %13 : vector<1x1x8x8xbf16> to vector<8x8xbf16>
    %15 = vector.shape_cast %12 : vector<8x8xbf16> to vector<1x1x8x8xbf16>
    tpu.vector_store %arg10[%c0_6, %c0_7, %c0_8, %c0_9], %15 {strides = array<i32>} : memref<1x1x8x8xbf16, #tpu.memory_space<vmem>>, vector<1x1x8x8xbf16>,
    %16 = arith.index_cast %arg2 : i32 to index
    %c0_10 = arith.constant 0 : index
    %c0_11 = arith.constant 0 : index
    %17 = vector.load %arg5[%16, %c0_10, %c0_11] : memref<4x32x8xbf16, #tpu.memory_space<vmem>>, vector<1x32x8xbf16>
    %18 = vector.shape_cast %17 : vector<1x32x8xbf16> to vector<32x8xbf16>
    %cst_12 = arith.constant dense<0.000000e+00> : vector<8x8xf32>
    %19 = tpu.matmul %2, %18, %cst_12 {dimension_numbers = #tpu.dot_dimension_numbers<[1], [0], [0], [1], [0, 0, 1, 1], [], []>} : vector<8x32xbf16>, vector<32x8xbf16>, vector<8x8xf32> -> vector<8x8xf32>
    %20 = arith.index_cast %arg2 : i32 to index
    %c0_13 = arith.constant 0 : index
    %c0_14 = arith.constant 0 : index
    %21 = vector.load %arg8[%20, %c0_13, %c0_14] : memref<4x1x8xf32, #tpu.memory_space<vmem>>, vector<1x1x8xf32>
    %22 = vector.shape_cast %21 : vector<1x1x8xf32> to vector<1x8xf32>
    %23 = vector.broadcast %22 : vector<1x8xf32> to vector<8x8xf32>
    %24 = arith.addf %19, %23 : vector<8x8xf32>
    %25 = arith.truncf %24 : vector<8x8xf32> to vector<8x8xbf16>
    %c0_15 = arith.constant 0 : index
    %c0_16 = arith.constant 0 : index
    %c0_17 = arith.constant 0 : index
    %c0_18 = arith.constant 0 : index
    %26 = vector.load %arg11[%c0_15, %c0_16, %c0_17, %c0_18] : memref<1x1x8x8xbf16, #tpu.memory_space<vmem>>, vector<1x1x8x8xbf16>
    %27 = vector.shape_cast %26 : vector<1x1x8x8xbf16> to vector<8x8xbf16>
    %28 = vector.shape_cast %25 : vector<8x8xbf16> to vector<1x1x8x8xbf16>
    tpu.vector_store %arg11[%c0_15, %c0_16, %c0_17, %c0_18], %28 {strides = array<i32>} : memref<1x1x8x8xbf16, #tpu.memory_space<vmem>>, vector<1x1x8x8xbf16>,
    %29 = arith.index_cast %arg2 : i32 to index
    %c0_19 = arith.constant 0 : index
    %c0_20 = arith.constant 0 : index
    %30 = vector.load %arg6[%29, %c0_19, %c0_20] : memref<4x32x8xbf16, #tpu.memory_space<vmem>>, vector<1x32x8xbf16>
    %31 = vector.shape_cast %30 : vector<1x32x8xbf16> to vector<32x8xbf16>
    %cst_21 = arith.constant dense<0.000000e+00> : vector<8x8xf32>
    %32 = tpu.matmul %2, %31, %cst_21 {dimension_numbers = #tpu.dot_dimension_numbers<[1], [0], [0], [1], [0, 0, 1, 1], [], []>} : vector<8x32xbf16>, vector<32x8xbf16>, vector<8x8xf32> -> vector<8x8xf32>
    %33 = arith.index_cast %arg2 : i32 to index
    %c0_22 = arith.constant 0 : index
    %c0_23 = arith.constant 0 : index
    %34 = vector.load %arg9[%33, %c0_22, %c0_23] : memref<4x1x8xf32, #tpu.memory_space<vmem>>, vector<1x1x8xf32>
    %35 = vector.shape_cast %34 : vector<1x1x8xf32> to vector<1x8xf32>
    %36 = vector.broadcast %35 : vector<1x8xf32> to vector<8x8xf32>
    %37 = arith.addf %32, %36 : vector<8x8xf32>
    %38 = arith.truncf %37 : vector<8x8xf32> to vector<8x8xbf16>
    %c0_24 = arith.constant 0 : index
    %c0_25 = arith.constant 0 : index
    %c0_26 = arith.constant 0 : index
    %c0_27 = arith.constant 0 : index
    %39 = vector.load %arg12[%c0_24, %c0_25, %c0_26, %c0_27] : memref<1x1x8x8xbf16, #tpu.memory_space<vmem>>, vector<1x1x8x8xbf16>
    %40 = vector.shape_cast %39 : vector<1x1x8x8xbf16> to vector<8x8xbf16>
    %41 = vector.shape_cast %38 : vector<8x8xbf16> to vector<1x1x8x8xbf16>
    tpu.vector_store %arg12[%c0_24, %c0_25, %c0_26, %c0_27], %41 {strides = array<i32>} : memref<1x1x8x8xbf16, #tpu.memory_space<vmem>>, vector<1x1x8x8xbf16>,
    return
  }
  func.func @transform_0(%arg0: i32, %arg1: i32, %arg2: i32) -> (i32, i32, i32) {
    %c0_i32 = arith.constant 0 : i32
    %c0_i32_0 = arith.constant 0 : i32
    return %arg0, %arg1, %c0_i32 : i32, i32, i32
  }
  func.func @transform_1(%arg0: i32, %arg1: i32, %arg2: i32) -> (i32, i32, i32) {
    %c0_i32 = arith.constant 0 : i32
    %c0_i32_0 = arith.constant 0 : i32
    %c0_i32_1 = arith.constant 0 : i32
    %c0_i32_2 = arith.constant 0 : i32
    return %c0_i32, %c0_i32_0, %c0_i32_1 : i32, i32, i32
  }
  func.func @transform_2(%arg0: i32, %arg1: i32, %arg2: i32) -> (i32, i32, i32) {
    %c0_i32 = arith.constant 0 : i32
    %c0_i32_0 = arith.constant 0 : i32
    %c0_i32_1 = arith.constant 0 : i32
    %c0_i32_2 = arith.constant 0 : i32
    return %c0_i32, %c0_i32_0, %c0_i32_1 : i32, i32, i32
  }
  func.func @transform_3(%arg0: i32, %arg1: i32, %arg2: i32) -> (i32, i32, i32) {
    %c0_i32 = arith.constant 0 : i32
    %c0_i32_0 = arith.constant 0 : i32
    %c0_i32_1 = arith.constant 0 : i32
    %c0_i32_2 = arith.constant 0 : i32
    return %c0_i32, %c0_i32_0, %c0_i32_1 : i32, i32, i32
  }
  func.func @transform_4(%arg0: i32, %arg1: i32, %arg2: i32) -> (i32, i32, i32) {
    %c0_i32 = arith.constant 0 : i32
    %c0_i32_0 = arith.constant 0 : i32
    %c0_i32_1 = arith.constant 0 : i32
    %c0_i32_2 = arith.constant 0 : i32
    return %c0_i32, %c0_i32_0, %c0_i32_1 : i32, i32, i32
  }
  func.func @transform_5(%arg0: i32, %arg1: i32, %arg2: i32) -> (i32, i32, i32) {
    %c0_i32 = arith.constant 0 : i32
    %c0_i32_0 = arith.constant 0 : i32
    %c0_i32_1 = arith.constant 0 : i32
    %c0_i32_2 = arith.constant 0 : i32
    return %c0_i32, %c0_i32_0, %c0_i32_1 : i32, i32, i32
  }
  func.func @transform_6(%arg0: i32, %arg1: i32, %arg2: i32) -> (i32, i32, i32) {
    %c0_i32 = arith.constant 0 : i32
    %c0_i32_0 = arith.constant 0 : i32
    %c0_i32_1 = arith.constant 0 : i32
    %c0_i32_2 = arith.constant 0 : i32
    return %c0_i32, %c0_i32_0, %c0_i32_1 : i32, i32, i32
  }
  func.func @transform_7(%arg0: i32, %arg1: i32, %arg2: i32) -> (i32, i32, i32, i32) {
    %c0_i32 = arith.constant 0 : i32
    %c0_i32_0 = arith.constant 0 : i32
    return %arg0, %arg2, %arg1, %c0_i32 : i32, i32, i32, i32
  }
  func.func @transform_8(%arg0: i32, %arg1: i32, %arg2: i32) -> (i32, i32, i32, i32) {
    %c0_i32 = arith.constant 0 : i32
    %c0_i32_0 = arith.constant 0 : i32
    return %arg0, %arg2, %arg1, %c0_i32 : i32, i32, i32, i32
  }
  func.func @transform_9(%arg0: i32, %arg1: i32, %arg2: i32) -> (i32, i32, i32, i32) {
    %c0_i32 = arith.constant 0 : i32
    %c0_i32_0 = arith.constant 0 : i32
    return %arg0, %arg2, %arg1, %c0_i32 : i32, i32, i32, i32
  }
}

</mosaic_0001>

<bundles_post_ra>
// kernel: tpu_custom_call.1
= control target key start
LH: loop header
LB: loop body
LE: loop exit
PB: predicated region body
PF: predicated region fallthrough
CT: control target
= control target key end

     0   :  { %s1440_s0 = inlined_call_operand.vmem [shape: f32[2,8,32], index: 0, kind: input, shape index: {}]   ;;  %s1441_s1 = inlined_call_operand.vmem [shape: bf16[4,32,8], index: 1, kind: input, shape index: {}]   ;;  %s1442_s2 = inlined_call_operand.vmem [shape: bf16[4,32,8], index: 2, kind: input, shape index: {}]   ;;  %s1443_s3 = inlined_call_operand.vmem [shape: bf16[4,32,8], index: 3, kind: input, shape index: {}]   ;;  %s1444_s4 = inlined_call_operand.vmem [shape: f32[4,1,8], index: 4, kind: input, shape index: {}]   ;;  %s1445_s5 = inlined_call_operand.vmem [shape: f32[4,1,8], index: 5, kind: input, shape index: {}]   ;;  %s1446_s6 = inlined_call_operand.vmem [shape: f32[4,1,8], index: 6, kind: input, shape index: {}]   ;;  %s1447_s7 = inlined_call_operand.hbm [shape: bf16[2,4,8,8], index: 7, kind: output, shape index: {0}]   ;;  %s1448_s8 = inlined_call_operand.hbm [shape: bf16[2,4,8,8], index: 8, kind: output, shape index: {1}]   ;;  %s1449_s9 = inlined_call_operand.hbm [shape: bf16[2,4,8,8], index: 9, kind: output, shape index: {2}]  }
   0x1   :  { %1457 = sst [smem:[#allocation12_spill]] %s1440_s0 }
   0x2   :  { %1458 = sst [smem:[#allocation13_spill]] %s1441_s1 }
   0x3   :  { %1459 = sst [smem:[#allocation14_spill]] %s1442_s2 }
   0x4   :  { %1460 = sst [smem:[#allocation15_spill]] %s1443_s3 }
   0x5   :  { %15 = vsyncpa [#allocation3], 0 }
   0x6   :  { %17 = vsyncpa [#allocation3 + $0x1], 0 }
   0x7   :  { %18 = vsyncpa [#allocation5], 0 }
   0x8   :  { %20 = vsyncpa [#allocation5 + $0x1], 0  ;;  %s1187_s30 = smov 0   ;;  %s1189_s10 = smov 0  }
   0x9   :  { %s1191_s11 = smov 0   ;;  %s1193_s12 = smov 0  }
   0xa   :  { %s1195_s13 = smov 0   ;;  %s1197_s14 = smov 0  }
   0xb   :  { %s1199_s15 = smov 0   ;;  %s1201_s16 = smov 0  }
   0xc LB: > { %1461 = sst [smem:[#allocation9_spill]] %s1126_s15  ;;  %s1451_s17 = sadd.s32 4294967295, %s1130_s16   ;;  %s1130_s16 = sphi %s1201_s16, %s26_s16   ;;  %s1126_s15 = sphi %s1199_s15, %s1476_s15   ;;  %s1122_s14 = sphi %s1197_s14, %s1481_s14   ;;  %s1118_s13 = sphi %s1195_s13, %s1474_s13   ;;  %s1114_s12 = sphi %s1193_s12, %s1480_s12   ;;  %s1110_s11 = sphi %s1191_s11, %s1479_s11   ;;  %s1106_s10 = sphi %s1189_s10, %s1478_s10   ;;  %s1102_s30 = sphi %s1187_s30, %s1477_s30  }
   0xd   : > { %s1450_s18 = sadd.s32 4294967294, %s1130_s16   ;;  %s38_s19 = sadd.s32 1, %s1122_s14 }
   0xe   : > { %p39_p0 = scmp.ge.s32.totalorder %s38_s19, 4  ;;  %s45_s20 = sadd.s32 1, %s1126_s15 }
   0xf   : > { %p220_p1 = scmp.ne.s32.totalorder %s1110_s11, %s1106_s10  ;;  %p221_p2 = scmp.eq.s32.totalorder %s1451_s17, 7 }
  0x10   : > { %s1483_s19 = smov (%p39_p0, %s38_s19), 0  ;;  %s1485_s20 = smov (!%p39_p0, %s45_s20), %s1126_s15 }
  0x11   : > { %1462 = sst [smem:[#allocation10_spill]] %s1483_s19  ;;  %s204_s21 = ssub.s32 %s1122_s14, %s1483_s19 }
  0x12   : > { %p1240_p3 = por %p221_p2, %p220_p1  ;;  %p47_p4 = scmp.ge.s32.totalorder %s1485_s20, 2 }
  0x13   : > { %p226_p5 = scmp.ne.s32.totalorder %s1106_s10, %s1102_s30  ;;  %p227_p6 = scmp.eq.s32.totalorder %s1450_s18, 7 }
  0x14   : > { %p819_p7 = scmp.ge.s32.totalorder %s1130_s16, 1  ;;  %s1487_s20 = smov (%p47_p4, %s1485_s20), 0 }
  0x15   : > { %1464 = sst [smem:[#allocation11_spill]] %s1487_s20  ;;  %p1251_p8 = por %p227_p6, %p226_p5 }
  0x16   : > { %p333_p9 = scmp.lt.s32.totalorder %s1130_s16, 9  ;;  %s203_s24 = ssub.s32 %s1126_s15, %s1487_s20 }
  0x17   : > { %s210_s25 = sadd.s32 1, %s1110_s11  ;;  %s205_s26 = sor.u32 %s204_s21, %s203_s24 }
  0x18   : > { %p334_p10 = pnand %p819_p7, %p333_p9  ;;  %p208_p11 = scmp.eq.s32.totalorder %s205_s26, 0 }
  0x19   : > { %s851_s28 = sshll.u32 (!%p334_p10), %s1114_s12, 4  ;;  %p381_p12 = scmp.lt.s32.totalorder (!%p334_p10), %s1118_s13, 1  ;;  %v1132_v0 = vmov (!%p334_p10), 0.0   ;;  %vm1133_vm0 = vmmov (!%p334_p10), 0   ;;  %vm418_vm1 = vcmask (!%p334_p10), 261120   ;;  %vm463_vm2 = vcmask (!%p334_p10), 60416  }
  0x1a   : > { %s1260_s27 = scalar_select %p208_p11, %s1110_s11, %s210_s25  }
  0x1b   : > { %337 = sbr.rel (%p334_p10) target bundleno = 319 (0x13f), region = 48  ;;  %863 = vmatprep.subr.bf16.mxu0 (!%p334_p10), %v1132_v0  ;;  %s1466_s1 = sld [smem:[#allocation13_spill]] (!%p334_p10)  ;;  %871 = vmatprep.subr.bf16.mxu1 (!%p334_p10), %v1132_v0 }
  0x1c   : > { %s1467_s2 = sld [smem:[#allocation14_spill]] (!%p334_p10)  ;;  %867 = vmatprep.mubr.msk.bf16.mxu0 (!%p334_p10), %vm1133_vm0, %v1132_v0  ;;  %875 = vmatprep.mubr.msk.bf16.mxu1 (!%p334_p10), %vm1133_vm0, %v1132_v0  ;;  %s1468_s3 = sld [smem:[#allocation15_spill]] (!%p334_p10) }
  0x1d   : > { %s1469_s0 = sld [smem:[#allocation12_spill]] (!%p334_p10)  ;;  %s398_s21 = scalar_lea.vmem (!%p334_p10), %s1444_s4, %s1114_s12 }
  0x1e   : > { %v826_v9 = vld [vmem:[%s398_s21] ss:$0 sm:$0xff] (!%p334_p10) }
  0x21   : > { %s393_s17 = scalar_lea.vmem (!%p334_p10), %s1466_s1, %s851_s28  ;;  %s1455_s1 = sand.u32 (!%p334_p10), 1, %s1106_s10  }
  0x22   : > { %v970_v1 = vld [vmem:[%s393_s17] sm:$0xff]   ;;  %s466_s24 = scalar_lea.vmem %s1467_s2, %s851_s28  ;;  %v971_v2 = vld [vmem:[%s393_s17 + $0x8] sm:$0xff]   ;;  %s534_s15 = scalar_lea.vmem %s1468_s3, %s851_s28 }
  0x23   : > { %s382_s25 = scalar_select %p381_p12, %s1118_s13, 1  ;;  %864 = vmatpush3.bf16.msra.mxu0 %v970_v1  ;;  %v972_v3 = vld [vmem:[%s466_s24] sm:$0xff]   ;;  %v974_v4 = vld [vmem:[%s466_s24 + $0x8] sm:$0xff]  }
  0x24   : > { %865 = vmatprep.subr.bf16.mxu0 %v1132_v0  ;;  %872 = vmatpush3.bf16.msra.mxu1 %v972_v3  ;;  %v973_v7 = vld [vmem:[%s534_s15] sm:$0xff]   ;;  %v975_v8 = vld [vmem:[%s534_s15 + $0x8] sm:$0xff]   ;;  %s843_s17 = sshll.u32 %s1118_s13, 2  ;;  %s1288_s24 = sshll.u32 %s1455_s1, 2 }
  0x25   : > { %s823_s18 = sshll.u32 %s382_s25, 3  ;;  %873 = vmatprep.subr.bf16.mxu1 %v1132_v0  ;;  %s471_s15 = scalar_lea.vmem %s1445_s5, %s1114_s12 }
  0x26   : > { %s387_s20 = scalar_lea.vmem %s1469_s0, %s823_s18  ;;  %s624_s18 = sadd.s32 %s1114_s12, %s843_s17  ;;  %v831_v11 = vld [vmem:[%s471_s15] ss:$0 sm:$0xff] }
  0x27   : > { %v389_v5 = vld [vmem:[%s387_s20] sm:$0xff]  ;;  %866 = vmatpush3.bf16.msra.mxu0 %v971_v2  ;;  %s1295_s29 = sshll.u32 %s624_s18, 6  ;;  %s366_s13 = scalar_lea.vmem [#allocation2], %s1288_s24 }
  0x28   : > { %v390_v6 = vpack.c.bf16 %v389_v5, %v389_v5  ;;  %879 = vmatprep.subr.bf16.mxu0 %v1132_v0  ;;  %874 = vmatpush3.bf16.msra.mxu1 %v974_v4  ;;  %s628_s20 = sshll.u32 %s366_s13, 4  ;;  %s539_s1 = scalar_lea.vmem %s1446_s6, %s1114_s12  ;;  %s1315_s20 = int_to_ptr.vmem [resolvable:$true] %s628_s20 }
  0x29   : > { %s1470_s25 = sadd.s32 4294967295, %s1130_s16   ;;  %s1456_s17 = scalar_lea.vmem [#allocation4], %s1288_s24  ;;  %v836_v23 = vld [vmem:[%s539_s1] ss:$0 sm:$0xff] }
  0x2a   : > { %868 = vmatmul.mubr.msk.bf16.vlgmr.msra.gmra.mrb[0].mxu0 %vm418_vm1, %v390_v6  ;;  %s1304_s26 = sand.u32 1, %s1470_s25   ;;  %s644_s21 = sshll.u32 %s1456_s17, 4  ;;  %s1323_s21 = int_to_ptr.vmem [resolvable:$true] %s644_s21 }
  0x2b   : > { %880 = vmatpush3.bf16.msra.mxu0 %v973_v7  ;;  %883 = vmatprep.mubr.msk.bf16.mxu0 %vm1133_vm0, %v1132_v0  ;;  %s1313_s12 = scalar_lea.hbm %s1447_s7, %s1295_s29  ;;  %s1321_s25 = scalar_lea.hbm %s1448_s8, %s1295_s29 }
  0x2c   : > { %881 = vmatprep.subr.bf16.mxu0 %v1132_v0  ;;  %876 = vmatmul.mubr.msk.bf16.vlgmr.msra.gmra.mrb[0].mxu1 %vm418_vm1, %v390_v6  ;;  %s1471_s15 = sand.u32 1, %s1106_s10   ;;  %s976_s17 = scalar_lea.vmem %s1315_s20, 64 }
  0x2d   : > { %s602_s18 = scalar_lea.sflag [#allocation3], %s1471_s15  ;;  %p977_p13 = scmp.ne.s32.totalorder %s1315_s20, %s976_s17 }
  0x2e   : > { %s1134_s0 = smov [#allocation2]  }
  0x2f   : > { %882 = vmatpush3.bf16.msra.mxu0 %v975_v8  ;;  %p978_p0 = pnand %p977_p13, %p1240_p3  ;;  %s980_s2 = sshll.u32 %s1134_s0, 4  ;;  %s981_s2 = int_to_ptr.vmem [resolvable:$false] %s980_s2 }
  0x30   : > { %s982_s3 = scalar_lea.vmem %s981_s2, 128  ;;  %p983_p2 = scmp.lt.s32.totalorder %s1315_s20, %s981_s2 }
  0x31   : > { %p979_p1 = pneg %p978_p0  ;;  %p984_p4 = scmp.lt.s32.totalorder %s982_s3, %s976_s17 }
  0x32   : > { %884 = vmatmul.mubr.msk.bf16.vlgmr.msra.gmra.mrb[4].mxu0 %vm418_vm1, %v390_v6 }
  0x33   : > { %p985_p5 = por %p984_p4, %p983_p2 }
  0x35   : > { %p986_p6 = pnand %p985_p5, %p979_p1 }
  0xfd   : > { %v456_v10 = vpop.f32.mrb[0].mxu0 }
  0xfe   : > { %v457_v12 = vadd.f32 %v826_v9, %v456_v10  ;;  %v869_v13 = vpop.f32.mrb[1].mxu0 }
  0xff   : > { %v459_v14 = vpop.f32.mrb[2].mxu0  ;;  %v525_v15 = vpop.f32.mrb[0].mxu1 }
 0x100   : > { %v462_v16 = vpack.c.bf16 %v457_v12, %v457_v12  ;;  %v870_v17 = vpop.f32.mrb[3].mxu0  ;;  %v526_v18 = vadd.f32 %v831_v11, %v525_v15  ;;  %v877_v19 = vpop.f32.mrb[1].mxu1 }
 0x101   : > { %v528_v20 = vpop.f32.mrb[2].mxu1 }
 0x102   : > { %v531_v21 = vpack.c.bf16 %v526_v18, %v526_v18  ;;  %v878_v22 = vpop.f32.mrb[3].mxu1  ;;  %464 = vst.msk [vmem:[%s366_s13] sm:$0xf] %vm463_vm2, %v462_v16 }
 0x103   : > { %989 = shalt.err (!%p986_p6)
}
 0x104   : > { %s990_s1 = scalar_lea.hbm %s1313_s12, 64  ;;  %s994_s0 = scalar_lea.hbm %s1447_s7, 512 }
 0x105   : > { %p991_p7 = scmp.ne.s32.totalorder %s1313_s12, %s990_s1  ;;  %p995_p11 = scmp.lt.u32.totalorder %s1313_s12, %s1447_s7 }
 0x106   : > { %p996_p12 = scmp.lt.u32.totalorder %s994_s0, %s990_s1  ;;  %p998_p0 = scmp.lt.u32.totalorder %s990_s1, %s1313_s12 }
 0x107   : > { %p992_p9 = pnand %p991_p7, %p1240_p3 }
 0x108   : > { %p997_p13 = por %p996_p12, %p995_p11 }
 0x109   : > { %p993_p10 = pneg %p992_p9 }
 0x10a   : > { %p999_p1 = por %p998_p0, %p997_p13 }
 0x10c   : > { %p1000_p2 = pnand %p999_p1, %p993_p10 }
 0x10e   : > { %1003 = shalt.err (!%p1000_p2)
}
 0x10f   : > { %887 = dma.vmem_to_hbm [thread:$0]  (%p1240_p3), %s1315_s20, 64, %s1313_s12, %s602_s18   ;;  %v593_v24 = vpop.f32.mrb[4].mxu0 }
 0x110   : > { %s1472_s3 = scalar_lea.vmem [#allocation4], %s1288_s24  ;;  %s380_s17 = scalar_lea.vmem [#allocation6], %s1288_s24 }
 0x111   : > { %532 = vst.msk [vmem:[%s1472_s3] sm:$0xf] %vm463_vm2, %v531_v21  ;;  %s1355_s15 = sshll.u32 %s380_s17, 4  ;;  %s607_s1 = scalar_lea.sflag [#allocation5], %s1304_s26  ;;  %s661_s15 = int_to_ptr.vmem [resolvable:$true] %s1355_s15 }
 0x112   : > { %s1004_s13 = scalar_lea.vmem %s1323_s21, 64  ;;  %s1135_s19 = smov [#allocation4]  }
 0x113   : > { %p1005_p4 = scmp.ne.s32.totalorder %s1323_s21, %s1004_s13  ;;  %s1008_s0 = sshll.u32 %s1135_s19, 4  ;;  %s1009_s0 = int_to_ptr.vmem [resolvable:$false] %s1008_s0 }
 0x114   : > { %s1010_s28 = scalar_lea.vmem %s1009_s0, 128  ;;  %p1011_p7 = scmp.lt.s32.totalorder %s1323_s21, %s1009_s0 }
 0x115   : > { %p1006_p5 = pnand %p1005_p4, %p1240_p3  ;;  %p1012_p9 = scmp.lt.s32.totalorder %s1010_s28, %s1004_s13 }
 0x117   : > { %p1007_p6 = pneg %p1006_p5  ;;  %p1013_p10 = por %p1012_p9, %p1011_p7 }
 0x119   : > { %p1014_p11 = pnand %p1013_p10, %p1007_p6 }
 0x11b   : > { %1017 = shalt.err (!%p1014_p11)
}
 0x11c   : > { %s1018_s20 = scalar_lea.hbm %s1321_s25, 64  ;;  %s1022_s2 = scalar_lea.hbm %s1448_s8, 512 }
 0x11d   : > { %p1019_p12 = scmp.ne.s32.totalorder %s1321_s25, %s1018_s20  ;;  %p1023_p1 = scmp.lt.u32.totalorder %s1321_s25, %s1448_s8 }
 0x11e   : > { %p1024_p2 = scmp.lt.u32.totalorder %s1022_s2, %s1018_s20  ;;  %p1026_p5 = scmp.lt.u32.totalorder %s1018_s20, %s1321_s25 }
 0x11f   : > { %p1020_p13 = pnand %p1019_p12, %p1240_p3 }
 0x120   : > { %p1025_p4 = por %p1024_p2, %p1023_p1 }
 0x121   : > { %p1021_p0 = pneg %p1020_p13 }
 0x122   : > { %p1027_p6 = por %p1026_p5, %p1025_p4 }
 0x124   : > { %p1028_p7 = pnand %p1027_p6, %p1021_p0 }
 0x126   : > { %1031 = shalt.err (!%p1028_p7)
}
 0x127   : > { %888 = dma.vmem_to_hbm [thread:$0]  (%p1240_p3), %s1323_s21, 64, %s1321_s25, %s607_s1   ;;  %v594_v25 = vadd.f32 %v836_v23, %v593_v24  ;;  %v885_v26 = vpop.f32.mrb[5].mxu0 }
 0x128   : > { %v596_v27 = vpop.f32.mrb[6].mxu0  ;;  %s1385_s28 = scalar_lea.hbm %s1449_s9, %s1295_s29  ;;  %s1032_s20 = scalar_lea.vmem %s661_s15, 64 }
 0x129   : > { %v599_v28 = vpack.c.bf16 %v594_v25, %v594_v25  ;;  %v886_v29 = vpop.f32.mrb[7].mxu0  ;;  %p1033_p9 = scmp.ne.s32.totalorder %s661_s15, %s1032_s20  ;;  %s1136_s21 = smov [#allocation6]  }
 0x12a   : > { %s1036_s25 = sshll.u32 %s1136_s21, 4  ;;  %s1037_s25 = int_to_ptr.vmem [resolvable:$false] %s1036_s25 }
 0x12b   : > { %600 = vst.msk [vmem:[%s380_s17] sm:$0xf] %vm463_vm2, %v599_v28  ;;  %p1034_p10 = pnand %p1033_p9, %p1240_p3  ;;  %s1038_s12 = scalar_lea.vmem %s1037_s25, 128 }
 0x12c   : > { %p1039_p12 = scmp.lt.s32.totalorder %s661_s15, %s1037_s25  ;;  %p1040_p13 = scmp.lt.s32.totalorder %s1038_s12, %s1032_s20 }
 0x12d   : > { %p1035_p11 = pneg %p1034_p10 }
 0x12e   : > { %p1041_p0 = por %p1040_p13, %p1039_p12 }
 0x130   : > { %p1042_p1 = pnand %p1041_p0, %p1035_p11 }
 0x132   : > { %1045 = shalt.err (!%p1042_p1)
}
 0x133   : > { %s1046_s24 = scalar_lea.hbm %s1385_s28, 64  ;;  %s1050_s18 = scalar_lea.hbm %s1449_s9, 512 }
 0x134   : > { %p1047_p2 = scmp.ne.s32.totalorder %s1385_s28, %s1046_s24  ;;  %p1051_p6 = scmp.lt.u32.totalorder %s1385_s28, %s1449_s9 }
 0x135   : > { %p1052_p7 = scmp.lt.u32.totalorder %s1050_s18, %s1046_s24  ;;  %p1054_p10 = scmp.lt.u32.totalorder %s1046_s24, %s1385_s28 }
 0x136   : > { %p1048_p4 = pnand %p1047_p2, %p1240_p3 }
 0x137   : > { %p1053_p9 = por %p1052_p7, %p1051_p6 }
 0x138   : > { %p1049_p5 = pneg %p1048_p4 }
 0x139   : > { %p1055_p11 = por %p1054_p10, %p1053_p9 }
 0x13b   : > { %p1056_p12 = pnand %p1055_p11, %p1049_p5 }
 0x13d   : > { %1059 = shalt.err (!%p1056_p12)
}
 0x13e   : > { %889 = dma.vmem_to_hbm [thread:$0]  (%p1240_p3), %s661_s15, 64, %s1385_s28, %s607_s1  }
 0x13f PF: > { %p903_p13 = scmp.ge.s32.totalorder %s1130_s16, 2  ;;  %s672_s19 = sand.u32 1, %s1102_s30  }
 0x140   : > { %s673_s13 = scalar_lea.sflag [#allocation3], %s672_s19 }
 0x141   : > { %p894_p0 = pnand %p903_p13, %p1251_p8 }
 0x143   : > { %1093 = dma.done.wait (!%p894_p0), %s673_s13, 64  }
 0x144   : > { %1095 = vsyncadd (!%p894_p0), %s673_s13, 4294967232  ;;  %s1473_s0 = sadd.s32 4294967294, %s1130_s16  }
 0x145   : > { %s681_s20 = sand.u32 1, %s1473_s0  }
 0x146   : > { %s682_s21 = scalar_lea.sflag [#allocation5], %s681_s20 }
 0x147   : > { %1097 = dma.done.wait (!%p894_p0), %s682_s21, 128  }
 0x148   : > { %1099 = vsyncadd (!%p894_p0), %s682_s21, 4294967168  ;;  %s26_s16 = sadd.s32 1, %s1130_s16   ;;  %s1474_s13 = sld [smem:[#allocation9_spill]] }
 0x149   : > { %p23_p3 = scmp.ge.s32.totalorder %s26_s16, 10   ;;  %s1475_s22 = sld [smem:[#allocation10_spill]] }
 0x14a   : > { %s1476_s15 = sld [smem:[#allocation11_spill]]  ;;  %s1477_s30 = smov %s1106_s10 }
 0x14b   : > { %s1478_s10 = smov %s1110_s11  ;;  %s1479_s11 = smov %s1260_s27 }
 0x14c   : > { %s1480_s12 = smov %s1122_s14  ;;  %25 = sbr.rel (!%p23_p3) target bundleno = 12 (0xc), region = 121 }
 0x14f   : > { %s1481_s14 = smov %s1475_s22 }
 0x153   :  { %696 = vsyncpa [#allocation3], 1 }
 0x154   :  { %698 = vsyncpa [#allocation3 + $0x1], 1 }
 0x155   :  { %699 = vsyncpa [#allocation5], 1 }
 0x156   :  { %701 = vsyncpa [#allocation5 + $0x1], 1 }

</bundles_post_ra>
